<compile_context>
chip_gen: v7x
topology: tpu7x:2x2x1
jax: 0.10.0
libtpu: 0.0.40
codegen_flags: <defaults>
</compile_context>

<pallas_src>
import math
import functools

import numpy as np
import jax
import jax.numpy as jnp
from jax import lax
from jax.experimental import pallas as pl
from jax.experimental.pallas import tpu as pltpu


def _round_up(x, m):
    return (x + m - 1) // m * m


# ----------------------------------------------------------------------------
# Spherical harmonics bases (gsplat `_eval_sh_bases_fast`, Sloan 2013 method).
# Used only by the pure-JAX reference; the kernel uses the folded monomial
# reparametrization below.
# ----------------------------------------------------------------------------
def _sh_columns(x, y, z, num_bases_to_use):
    cols = [jnp.full_like(x, 0.2820947917738781)]
    if num_bases_to_use > 1:
        fTmpA = -0.48860251190292
        cols += [fTmpA * y, -fTmpA * z, fTmpA * x]
    if num_bases_to_use > 4:
        z2 = z * z
        fTmpB = -1.092548430592079 * z
        fTmpA = 0.5462742152960395
        fC1 = x * x - y * y
        fS1 = 2.0 * x * y
        cols += [
            fTmpA * fS1,
            fTmpB * y,
            0.9461746957575601 * z2 - 0.3153915652525201,
            fTmpB * x,
            fTmpA * fC1,
        ]
    if num_bases_to_use > 9:
        z2 = z * z
        fC1 = x * x - y * y
        fS1 = 2.0 * x * y
        fTmpC = -2.285228997322329 * z2 + 0.4570457994644658
        fTmpB = 1.445305721320277 * z
        fTmpA = -0.5900435899266435
        fC2 = x * fC1 - y * fS1
        fS2 = x * fS1 + y * fC1
        cols += [
            fTmpA * fS2,
            fTmpB * fS1,
            fTmpC * y,
            z * (1.865881662950577 * z2 - 1.119528997770346),
            fTmpC * x,
            fTmpB * fC1,
            fTmpA * fC2,
        ]
    return cols
    # TODO(synk): degree-4 SH terms (bases 16..24) not implemented; the module
    # default sh_degree=3 only needs 16 bases (asserted in the wrapper).


# ----------------------------------------------------------------------------
# Exact SH -> monomial reparametrization matrix.
# Monomial ordering (matches the group-wise construction in the kernel):
#   0:1  1:x  2:y  3:z  4:x2  5:y2  6:z2  7:xy  8:yz  9:xz
#   10:x3 11:y3 12:z3 13:x2y 14:y2z 15:xz2 16:x2z 17:xy2 18:yz2 19:xyz
# ----------------------------------------------------------------------------
def _sh_to_monomial_matrix(sh_degree):
    nb = (sh_degree + 1) ** 2
    nm = (1, 4, 10, 20)[sh_degree]
    M = np.zeros((nb, nm), np.float64)
    entries = [
        (0, 0, 0.2820947917738781),
        (1, 2, -0.48860251190292),
        (2, 3, 0.48860251190292),
        (3, 1, -0.48860251190292),
        (4, 7, 2.0 * 0.5462742152960395),                 # xy
        (5, 8, -1.092548430592079),                       # yz
        (6, 6, 0.9461746957575601), (6, 0, -0.3153915652525201),
        (7, 9, -1.092548430592079),                       # xz
        (8, 4, 0.5462742152960395), (8, 5, -0.5462742152960395),
        (9, 13, -3.0 * 0.5900435899266435), (9, 11, 0.5900435899266435),
        (10, 19, 2.0 * 1.445305721320277),                # xyz
        (11, 18, -2.285228997322329), (11, 2, 0.4570457994644658),
        (12, 12, 1.865881662950577), (12, 3, -1.119528997770346),
        (13, 15, -2.285228997322329), (13, 1, 0.4570457994644658),
        (14, 16, 1.445305721320277), (14, 14, -1.445305721320277),
        (15, 10, -0.5900435899266435), (15, 17, 3.0 * 0.5900435899266435),
    ]
    for i, j, v in entries:
        if i < nb:
            M[i, j] = v
    return jnp.asarray(M, jnp.float32)


# ----------------------------------------------------------------------------
# Pallas kernel: one (N-tile, camera) block per grid step.
# ----------------------------------------------------------------------------
def _appearance_kernel(emb_ref, feats_ref, dirs_ref,
                       w1_ref, w2_ref, b2_ref, w3_ref, b3_ref,
                       out_ref, rhs_ref, *, feat_dim, num_mono, mxu_dtype):
    c = pl.program_id(1)
    dt = rhs_ref.dtype

    # Camera-independent feature rows of the fused layer-1 RHS: written once
    # per N-tile (the camera axis is the innermost, sequentially iterated
    # "arbitrary" grid axis, and scratch persists across grid steps per core).
    @pl.when(c == 0)
    def _():
        rhs_ref[0:feat_dim, :] = feats_ref[...].astype(dt)

    # Normalize dirs (F.normalize, eps=1e-12) as a lane-dense (3, tn) tile;
    # rsqrt goes to the EUP slot (effectively free vs sqrt + div on the VPU).
    d = dirs_ref[0].astype(jnp.float32)                        # (3, tn)
    dd = d * d
    inv = lax.rsqrt(jnp.maximum(dd[0:1] + dd[1:2] + dd[2:3], 1e-24))
    dn = d * inv                                               # normalized

    # Monomial rows {1, x, y, z, quadratics, cubics}: SH constants are folded
    # into w1 in the wrapper, so only raw monomials are built here, written
    # group-wise into the shared layer-1 RHS scratch (low live-vreg count, no
    # 16-way concat of 1-sublane rows).
    b = feat_dim
    rhs_ref[b:b + 1, :] = jnp.ones_like(inv).astype(dt)        # 1
    if num_mono > 1:
        rhs_ref[b + 1:b + 4, :] = dn.astype(dt)                # x, y, z
    if num_mono > 4:
        sq = dd * (inv * inv)                                  # x2, y2, z2
        dr1 = jnp.concatenate([dn[1:3], dn[0:1]], axis=0)      # y, z, x
        cr = dn * dr1                                          # xy, yz, xz
        rhs_ref[b + 4:b + 7, :] = sq.astype(dt)
        rhs_ref[b + 7:b + 10, :] = cr.astype(dt)
    if num_mono > 10:
        dr2 = jnp.concatenate([dn[2:3], dn[0:2]], axis=0)      # z, x, y
        rhs_ref[b + 10:b + 13, :] = (sq * dn).astype(dt)       # x3, y3, z3
        rhs_ref[b + 13:b + 16, :] = (sq * dr1).astype(dt)      # x2y, y2z, xz2
        rhs_ref[b + 16:b + 19, :] = (sq * dr2).astype(dt)      # x2z, xy2, yz2
        rhs_ref[b + 19:b + 20, :] = (cr[0:1] * dn[2:3]).astype(dt)  # xyz

    # Layer 1: single fused [features | monomials] matmul + per-camera
    # (embeds @ W1_e + b1) column term, then ReLU.
    acc = jnp.dot(w1_ref[...], rhs_ref[...], preferred_element_type=jnp.float32)
    h = jnp.maximum(acc + emb_ref[0], 0.0)                     # (W, tn)

    # Layer 2 + ReLU.
    h = jnp.maximum(
        jnp.dot(w2_ref[...], h.astype(mxu_dtype),
                preferred_element_type=jnp.float32) + b2_ref[...], 0.0)

    # Output head (3, tn): unmasked lane-dense store.
    out = (jnp.dot(w3_ref[...], h.astype(mxu_dtype),
                   preferred_element_type=jnp.float32) + b3_ref[...])
    out_ref[0] = out.astype(out_ref.dtype)


# ----------------------------------------------------------------------------
# Wrapper
# ----------------------------------------------------------------------------
def appearance_opt_forward(features, embed_ids, dirs, params, *,
                           sh_degree, sh_degree_max=3, tile_n=2048,
                           mxu_dtype=jnp.float32, transpose_output=True):
    C, N, three = dirs.shape
    assert three == 3
    feat_dim = features.shape[1]
    embed_dim = params["embed_table"].shape[1]
    mlp_width = params["w2"].shape[0]
    nb_use = (sh_degree + 1) ** 2
    nb_all = (sh_degree_max + 1) ** 2
    assert 0 <= sh_degree <= sh_degree_max
    assert sh_degree <= 3, "SH bases implemented up to degree 3 only"
    assert params["w1"].shape[0] == embed_dim + feat_dim + nb_all
    num_mono = (1, 4, 10, 20)[sh_degree]

    # glue: embedding gather + hoisted per-camera term (embeds @ W1_e + b1).
    if embed_ids is None:
        embeds = jnp.zeros((C, embed_dim), jnp.float32)
    else:
        embeds = params["embed_table"][embed_ids]
    w1 = params["w1"].astype(jnp.float32)
    emb_col = (embeds.astype(jnp.float32) @ w1[:embed_dim]
               + params["b1"].astype(jnp.float32))[:, :, None]      # (C, W, 1)

    # glue: fold SH constants into the layer-1 weight (monomial basis) and
    # fuse feature/SH sub-blocks into a single (W, F+nm) matrix.  SH bases
    # beyond nb_use multiply exact zeros in the reference -> rows dropped.
    w1f_t = w1[embed_dim:embed_dim + feat_dim].T                     # (W, F)
    w1s_t = w1[embed_dim + feat_dim:embed_dim + feat_dim + nb_use].T  # (W, nb)
    w1m_t = w1s_t @ _sh_to_monomial_matrix(sh_degree)                # (W, nm)
    w1_t = jnp.concatenate([w1f_t, w1m_t], axis=1).astype(mxu_dtype)
    w2_t = params["w2"].T.astype(mxu_dtype)                          # (W, W)
    b2_t = params["b2"].T.astype(jnp.float32)                        # (W, 1)
    w3_t = params["w3"].T.astype(mxu_dtype)                          # (3, W)
    b3_t = params["b3"].T.astype(jnp.float32)                        # (3, 1)

    # N lives on lanes.  Cap tn so the parallel N-tile axis keeps >= ~4 tiles
    # for large N (feeds both v7x TensorCores); pad N up to a tile multiple so
    # any N is accepted.  tn is a multiple of 256 (full MXU pass everywhere).
    tn_cap = _round_up(max(1, -(-N // 4)), 256)
    tn = max(256, min(_round_up(int(tile_n), 256), tn_cap))
    n_pad = _round_up(N, tn)

    # NOTE(perf): these pad+transpose relayouts (and the output transpose
    # below) are extra HBM passes in XLA; callers that can consume/produce the
    # lane-dense (C, 3, N) layout should pass transpose_output=False and feed
    # pre-transposed tensors to avoid them.
    feats_t = jnp.pad(features.astype(mxu_dtype),
                      ((0, n_pad - N), (0, 0))).T                    # (F, n_pad)
    dirs_t = jnp.transpose(
        jnp.pad(dirs.astype(jnp.float32), ((0, 0), (0, n_pad - N), (0, 0))),
        (0, 2, 1))                                                   # (C, 3, n_pad)

    grid = (n_pad // tn, C)

    def full_spec(arr):
        nd = arr.ndim
        return pl.BlockSpec(arr.shape, lambda n, c, _nd=nd: (0,) * _nd)

    kern = functools.partial(_appearance_kernel, feat_dim=feat_dim,
                             num_mono=num_mono, mxu_dtype=mxu_dtype)

    out_t = pl.pallas_call(
        kern,
        out_shape=jax.ShapeDtypeStruct((C, 3, n_pad), jnp.float32),
        grid_spec=pltpu.PrefetchScalarGridSpec(
            num_scalar_prefetch=0,
            grid=grid,
            in_specs=[
                pl.BlockSpec((1, mlp_width, 1), lambda n, c: (c, 0, 0)),  # emb
                pl.BlockSpec((feat_dim, tn), lambda n, c: (0, n)),        # feats^T
                pl.BlockSpec((1, 3, tn), lambda n, c: (c, 0, n)),         # dirs^T
                full_spec(w1_t), full_spec(w2_t), full_spec(b2_t),
                full_spec(w3_t), full_spec(b3_t),
            ],
            out_specs=pl.BlockSpec((1, 3, tn), lambda n, c: (c, 0, n)),
            # Fused layer-1 RHS: [features(F) ; monomials(nm)] x tn.
            scratch_shapes=[pltpu.VMEM((feat_dim + num_mono, tn), mxu_dtype)],
        ),
        # Axis 1 (cameras) MUST stay innermost & "arbitrary": the feature rows
        # of the RHS scratch are cached per N-tile under pl.when(c == 0).
        compiler_params=pltpu.CompilerParams(
            dimension_semantics=("parallel", "arbitrary")),
    )(emb_col, feats_t, dirs_t, w1_t, w2_t, b2_t, w3_t, b3_t)

    if transpose_output:
        return jnp.transpose(out_t, (0, 2, 1))[:, :N, :]   # module layout (C,N,3)
    return out_t[:, :, :N]                                 # lane-dense (C,3,N)


# ----------------------------------------------------------------------------
# Deterministic parameter init (shapes match the PyTorch module __init__)
# ----------------------------------------------------------------------------
def init_params(key, n, feature_dim, embed_dim=16, sh_degree=3, mlp_width=64):
    num_bases = (sh_degree + 1) ** 2
    in_dim = embed_dim + feature_dim + num_bases
    ks = jax.random.split(key, 7)

    def linear(kw, kb, fan_in, fan_out):
        lim = 1.0 / math.sqrt(fan_in)
        w = jax.random.uniform(kw, (fan_in, fan_out), jnp.float32, -lim, lim)
        b = jax.random.uniform(kb, (1, fan_out), jnp.float32, -lim, lim)
        return w, b

    embed_table = jax.random.normal(ks[0], (n, embed_dim), jnp.float32)
    w1, b1 = linear(ks[1], ks[2], in_dim, mlp_width)
    w2, b2 = linear(ks[3], ks[4], mlp_width, mlp_width)
    w3, b3 = linear(ks[5], ks[6], mlp_width, 3)
    return dict(embed_table=embed_table, w1=w1, b1=b1,
                w2=w2, b2=b2, w3=w3, b3=b3)


# ----------------------------------------------------------------------------
# Pure-JAX reference (mirrors the PyTorch forward, Sloan SH formulas).
# ----------------------------------------------------------------------------
def reference_forward(features, embed_ids, dirs, params, *,
                      sh_degree, sh_degree_max=3):
    C, N, _ = dirs.shape
    E = params["embed_table"].shape[1]
    embeds = params["embed_table"][embed_ids]
    embeds = jnp.broadcast_to(embeds[:, None, :], (C, N, E))
    feats = jnp.broadcast_to(features[None], (C, N, features.shape[1]))
    d = dirs / jnp.maximum(
        jnp.linalg.norm(dirs, axis=-1, keepdims=True), 1e-12)
    nb_use = (sh_degree + 1) ** 2
    nb_all = (sh_degree_max + 1) ** 2
    x, y, z = d[..., 0:1], d[..., 1:2], d[..., 2:3]
    sh = jnp.concatenate(_sh_columns(x, y, z, nb_use), axis=-1)
    sh = jnp.pad(sh, ((0, 0), (0, 0), (0, nb_all - nb_use)))
    h = jnp.concatenate([embeds, feats, sh], axis=-1)
    h = jnp.maximum(h @ params["w1"] + params["b1"][0], 0.0)
    h = jnp.maximum(h @ params["w2"] + params["b2"][0], 0.0)
    return h @ params["w3"] + params["b3"][0]


if __name__ == "__main__":
    # Module-consistent small shapes:
    #   n (num embeddings)=4, feature_dim=16, embed_dim=16,
    #   sh_degree_max=3 (16 SH bases), mlp_width=64, mlp_depth=2.
    n_embeddings, feature_dim, embed_dim = 4, 16, 16
    sh_degree_max, mlp_width = 3, 64

    key = jax.random.PRNGKey(0)
    k_par, k_feat, k_dirs, k_feat2, k_dirs2 = jax.random.split(key, 5)

    params = init_params(k_par, n_embeddings, feature_dim,
                         embed_dim=embed_dim, sh_degree=sh_degree_max,
                         mlp_width=mlp_width)

    # case 1: C=2, N=128, full SH degree 3.
    C, N = 2, 128
    features = jax.random.normal(k_feat, (N, feature_dim), jnp.float32)
    dirs = jax.random.normal(k_dirs, (C, N, 3), jnp.float32)
    embed_ids = jnp.array([0, 2], dtype=jnp.int32)

    colors = appearance_opt_forward(features, embed_ids, dirs, params,
                                    sh_degree=3, sh_degree_max=sh_degree_max)
    colors = jax.block_until_ready(colors)
    ref = reference_forward(features, embed_ids, dirs, params,
                            sh_degree=3, sh_degree_max=sh_degree_max)
    assert colors.shape == (C, N, 3)
    assert jnp.allclose(colors, ref, atol=1e-4, rtol=1e-4), (
        float(jnp.max(jnp.abs(colors - ref))))

    # case 2: C=3, N=600, sh_degree=2, tile_n=256 -> multi-tile grid
    # (exercises N padding and the per-tile feature-row caching across cameras).
    C2, N2 = 3, 600
    features2 = jax.random.normal(k_feat2, (N2, feature_dim), jnp.float32)
    dirs2 = jax.random.normal(k_dirs2, (C2, N2, 3), jnp.float32)
    embed_ids2 = jnp.array([1, 3, 0], dtype=jnp.int32)

    colors2 = appearance_opt_forward(features2, embed_ids2, dirs2, params,
                                     sh_degree=2, sh_degree_max=sh_degree_max,
                                     tile_n=256)
    colors2 = jax.block_until_ready(colors2)
    ref2 = reference_forward(features2, embed_ids2, dirs2, params,
                             sh_degree=2, sh_degree_max=sh_degree_max)
    assert colors2.shape == (C2, N2, 3)
    assert jnp.allclose(colors2, ref2, atol=1e-4, rtol=1e-4), (
        float(jnp.max(jnp.abs(colors2 - ref2))))

    # case 3: reduced sh_degree=1 on the same data (small monomial set path).
    colors3 = appearance_opt_forward(features2, embed_ids2, dirs2, params,
                                     sh_degree=1, sh_degree_max=sh_degree_max)
    colors3 = jax.block_until_ready(colors3)
    ref3 = reference_forward(features2, embed_ids2, dirs2, params,
                             sh_degree=1, sh_degree_max=sh_degree_max)
    assert jnp.allclose(colors3, ref3, atol=1e-4, rtol=1e-4), (
        float(jnp.max(jnp.abs(colors3 - ref3))))

    print("KERNEL_OK")
</pallas_src>

<mosaic_0001>
module attributes {stable_mosaic.version = 11 : i64} {
  func.func @_appearance_kernel(%arg0: i32, %arg1: i32, %arg2: memref<1x64x1xf32, #tpu.memory_space<vmem>>, %arg3: memref<16x256xf32, #tpu.memory_space<vmem>>, %arg4: memref<1x3x256xf32, #tpu.memory_space<vmem>>, %arg5: memref<64x36xf32, #tpu.memory_space<vmem>>, %arg6: memref<64x64xf32, #tpu.memory_space<vmem>>, %arg7: memref<64x1xf32, #tpu.memory_space<vmem>>, %arg8: memref<3x64xf32, #tpu.memory_space<vmem>>, %arg9: memref<3x1xf32, #tpu.memory_space<vmem>>, %arg10: memref<1x3x256xf32, #tpu.memory_space<vmem>>, %arg11: memref<36x256xf32, #tpu.memory_space<vmem>>) attributes {dimension_semantics = [#tpu.dimension_semantics<parallel>, #tpu.dimension_semantics<arbitrary>], iteration_bounds = array<i64: 1, 2>, scalar_prefetch = 0 : i64, scratch_operands = 1 : i64, tpu.core_type = #tpu.core_type<tc>, window_params = [{transform_indices = @transform_0, window_bounds = array<i64: 1, 64, 1>}, {transform_indices = @transform_1, window_bounds = array<i64: 16, 256>}, {transform_indices = @transform_2, window_bounds = array<i64: 1, 3, 256>}, {pipeline_mode = #tpu.pipeline_mode<synchronous>, transform_indices = @transform_3, window_bounds = array<i64: 64, 36>}, {pipeline_mode = #tpu.pipeline_mode<synchronous>, transform_indices = @transform_4, window_bounds = array<i64: 64, 64>}, {pipeline_mode = #tpu.pipeline_mode<synchronous>, transform_indices = @transform_5, window_bounds = array<i64: 64, 1>}, {pipeline_mode = #tpu.pipeline_mode<synchronous>, transform_indices = @transform_6, window_bounds = array<i64: 3, 64>}, {pipeline_mode = #tpu.pipeline_mode<synchronous>, transform_indices = @transform_7, window_bounds = array<i64: 3, 1>}, {transform_indices = @transform_8, window_bounds = array<i64: 1, 3, 256>}]} {
    %c0_i32 = arith.constant 0 : i32
    %0 = arith.cmpi eq, %arg1, %c0_i32 : i32
    %1 = arith.extui %0 : i1 to i32
    %c0_i32_0 = arith.constant 0 : i32
    %2 = arith.cmpi ne, %1, %c0_i32_0 : i32
    scf.if %2 {
      %c0_35 = arith.constant 0 : index
      %c0_36 = arith.constant 0 : index
      %65 = vector.load %arg3[%c0_35, %c0_36] : memref<16x256xf32, #tpu.memory_space<vmem>>, vector<16x256xf32>
      %c0_37 = arith.constant 0 : index
      %c0_38 = arith.constant 0 : index
      %66 = vector.load %arg11[%c0_37, %c0_38] : memref<36x256xf32, #tpu.memory_space<vmem>>, vector<16x256xf32>
      tpu.vector_store %arg11[%c0_37, %c0_38], %65 {strides = array<i32>} : memref<36x256xf32, #tpu.memory_space<vmem>>, vector<16x256xf32>,
    } else {
    }
    %c0 = arith.constant 0 : index
    %c0_1 = arith.constant 0 : index
    %c0_2 = arith.constant 0 : index
    %3 = vector.load %arg4[%c0, %c0_1, %c0_2] : memref<1x3x256xf32, #tpu.memory_space<vmem>>, vector<1x3x256xf32>
    %4 = vector.shape_cast %3 : vector<1x3x256xf32> to vector<3x256xf32>
    %5 = arith.mulf %4, %4 : vector<3x256xf32>
    %6 = vector.extract_strided_slice %5 {offsets = [0, 0], sizes = [1, 256], strides = [1, 1]} : vector<3x256xf32> to vector<1x256xf32>
    %7 = vector.extract_strided_slice %5 {offsets = [1, 0], sizes = [1, 256], strides = [1, 1]} : vector<3x256xf32> to vector<1x256xf32>
    %8 = arith.addf %6, %7 : vector<1x256xf32>
    %9 = vector.extract_strided_slice %5 {offsets = [2, 0], sizes = [1, 256], strides = [1, 1]} : vector<3x256xf32> to vector<1x256xf32>
    %10 = arith.addf %8, %9 : vector<1x256xf32>
    %cst = arith.constant 1.000000e-24 : f32
    %11 = vector.broadcast %cst : f32 to vector<1x256xf32>
    %12 = arith.maximumf %10, %11 : vector<1x256xf32>
    %13 = math.rsqrt %12 : vector<1x256xf32>
    %14 = vector.broadcast %13 : vector<1x256xf32> to vector<3x256xf32>
    %15 = arith.mulf %4, %14 : vector<3x256xf32>
    %cst_3 = arith.constant 1.000000e+00 : f32
    %16 = vector.broadcast %cst_3 : f32 to vector<1x256xf32>
    %c16 = arith.constant 16 : index
    %c0_4 = arith.constant 0 : index
    %17 = vector.load %arg11[%c16, %c0_4] : memref<36x256xf32, #tpu.memory_space<vmem>>, vector<1x256xf32>
    tpu.vector_store %arg11[%c16, %c0_4], %16 {strides = array<i32>} : memref<36x256xf32, #tpu.memory_space<vmem>>, vector<1x256xf32>,
    %c17 = arith.constant 17 : index
    %c0_5 = arith.constant 0 : index
    %18 = vector.load %arg11[%c17, %c0_5] : memref<36x256xf32, #tpu.memory_space<vmem>>, vector<3x256xf32>
    tpu.vector_store %arg11[%c17, %c0_5], %15 {strides = array<i32>} : memref<36x256xf32, #tpu.memory_space<vmem>>, vector<3x256xf32>,
    %19 = arith.mulf %13, %13 : vector<1x256xf32>
    %20 = vector.broadcast %19 : vector<1x256xf32> to vector<3x256xf32>
    %21 = arith.mulf %5, %20 : vector<3x256xf32>
    %22 = vector.extract_strided_slice %15 {offsets = [1, 0], sizes = [2, 256], strides = [1, 1]} : vector<3x256xf32> to vector<2x256xf32>
    %23 = vector.extract_strided_slice %15 {offsets = [0, 0], sizes = [1, 256], strides = [1, 1]} : vector<3x256xf32> to vector<1x256xf32>
    %24 = tpu.concatenate %22, %23 in 0 : vector<2x256xf32>, vector<1x256xf32> -> vector<3x256xf32>
    %25 = arith.mulf %15, %24 : vector<3x256xf32>
    %c20 = arith.constant 20 : index
    %c0_6 = arith.constant 0 : index
    %26 = vector.load %arg11[%c20, %c0_6] : memref<36x256xf32, #tpu.memory_space<vmem>>, vector<3x256xf32>
    tpu.vector_store %arg11[%c20, %c0_6], %21 {strides = array<i32>} : memref<36x256xf32, #tpu.memory_space<vmem>>, vector<3x256xf32>,
    %c23 = arith.constant 23 : index
    %c0_7 = arith.constant 0 : index
    %27 = vector.load %arg11[%c23, %c0_7] : memref<36x256xf32, #tpu.memory_space<vmem>>, vector<3x256xf32>
    tpu.vector_store %arg11[%c23, %c0_7], %25 {strides = array<i32>} : memref<36x256xf32, #tpu.memory_space<vmem>>, vector<3x256xf32>,
    %28 = vector.extract_strided_slice %15 {offsets = [2, 0], sizes = [1, 256], strides = [1, 1]} : vector<3x256xf32> to vector<1x256xf32>
    %29 = vector.extract_strided_slice %15 {offsets = [0, 0], sizes = [2, 256], strides = [1, 1]} : vector<3x256xf32> to vector<2x256xf32>
    %30 = tpu.concatenate %28, %29 in 0 : vector<1x256xf32>, vector<2x256xf32> -> vector<3x256xf32>
    %31 = arith.mulf %21, %15 : vector<3x256xf32>
    %c26 = arith.constant 26 : index
    %c0_8 = arith.constant 0 : index
    %32 = vector.load %arg11[%c26, %c0_8] : memref<36x256xf32, #tpu.memory_space<vmem>>, vector<3x256xf32>
    tpu.vector_store %arg11[%c26, %c0_8], %31 {strides = array<i32>} : memref<36x256xf32, #tpu.memory_space<vmem>>, vector<3x256xf32>,
    %33 = arith.mulf %21, %24 : vector<3x256xf32>
    %c29 = arith.constant 29 : index
    %c0_9 = arith.constant 0 : index
    %34 = vector.load %arg11[%c29, %c0_9] : memref<36x256xf32, #tpu.memory_space<vmem>>, vector<3x256xf32>
    tpu.vector_store %arg11[%c29, %c0_9], %33 {strides = array<i32>} : memref<36x256xf32, #tpu.memory_space<vmem>>, vector<3x256xf32>,
    %35 = arith.mulf %21, %30 : vector<3x256xf32>
    %c32 = arith.constant 32 : index
    %c0_10 = arith.constant 0 : index
    %36 = vector.load %arg11[%c32, %c0_10] : memref<36x256xf32, #tpu.memory_space<vmem>>, vector<3x256xf32>
    tpu.vector_store %arg11[%c32, %c0_10], %35 {strides = array<i32>} : memref<36x256xf32, #tpu.memory_space<vmem>>, vector<3x256xf32>,
    %37 = vector.extract_strided_slice %25 {offsets = [0, 0], sizes = [1, 256], strides = [1, 1]} : vector<3x256xf32> to vector<1x256xf32>
    %38 = vector.extract_strided_slice %15 {offsets = [2, 0], sizes = [1, 256], strides = [1, 1]} : vector<3x256xf32> to vector<1x256xf32>
    %39 = arith.mulf %37, %38 : vector<1x256xf32>
    %c35 = arith.constant 35 : index
    %c0_11 = arith.constant 0 : index
    %40 = vector.load %arg11[%c35, %c0_11] : memref<36x256xf32, #tpu.memory_space<vmem>>, vector<1x256xf32>
    tpu.vector_store %arg11[%c35, %c0_11], %39 {strides = array<i32>} : memref<36x256xf32, #tpu.memory_space<vmem>>, vector<1x256xf32>,
    %c0_12 = arith.constant 0 : index
    %c0_13 = arith.constant 0 : index
    %41 = vector.load %arg5[%c0_12, %c0_13] : memref<64x36xf32, #tpu.memory_space<vmem>>, vector<64x36xf32>
    %c0_14 = arith.constant 0 : index
    %c0_15 = arith.constant 0 : index
    %42 = vector.load %arg11[%c0_14, %c0_15] : memref<36x256xf32, #tpu.memory_space<vmem>>, vector<36x256xf32>
    %cst_16 = arith.constant dense<0.000000e+00> : vector<64x256xf32>
    %43 = tpu.matmul %41, %42, %cst_16 {dimension_numbers = #tpu.dot_dimension_numbers<[1], [0], [0], [1], [0, 0, 1, 1], [], []>} : vector<64x36xf32>, vector<36x256xf32>, vector<64x256xf32> -> vector<64x256xf32>
    %c0_17 = arith.constant 0 : index
    %c0_18 = arith.constant 0 : index
    %c0_19 = arith.constant 0 : index
    %44 = vector.load %arg2[%c0_17, %c0_18, %c0_19] : memref<1x64x1xf32, #tpu.memory_space<vmem>>, vector<1x64x1xf32>
    %45 = vector.shape_cast %44 : vector<1x64x1xf32> to vector<64x1xf32>
    %46 = vector.broadcast %45 : vector<64x1xf32> to vector<64x256xf32>
    %47 = arith.addf %43, %46 : vector<64x256xf32>
    %cst_20 = arith.constant 0.000000e+00 : f32
    %48 = vector.broadcast %cst_20 : f32 to vector<64x256xf32>
    %49 = arith.maximumf %47, %48 : vector<64x256xf32>
    %c0_21 = arith.constant 0 : index
    %c0_22 = arith.constant 0 : index
    %50 = vector.load %arg6[%c0_21, %c0_22] : memref<64x64xf32, #tpu.memory_space<vmem>>, vector<64x64xf32>
    %cst_23 = arith.constant dense<0.000000e+00> : vector<64x256xf32>
    %51 = tpu.matmul %50, %49, %cst_23 {dimension_numbers = #tpu.dot_dimension_numbers<[1], [0], [0], [1], [0, 0, 1, 1], [], []>} : vector<64x64xf32>, vector<64x256xf32>, vector<64x256xf32> -> vector<64x256xf32>
    %c0_24 = arith.constant 0 : index
    %c0_25 = arith.constant 0 : index
    %52 = vector.load %arg7[%c0_24, %c0_25] : memref<64x1xf32, #tpu.memory_space<vmem>>, vector<64x1xf32>
    %53 = vector.broadcast %52 : vector<64x1xf32> to vector<64x256xf32>
    %54 = arith.addf %51, %53 : vector<64x256xf32>
    %cst_26 = arith.constant 0.000000e+00 : f32
    %55 = vector.broadcast %cst_26 : f32 to vector<64x256xf32>
    %56 = arith.maximumf %54, %55 : vector<64x256xf32>
    %c0_27 = arith.constant 0 : index
    %c0_28 = arith.constant 0 : index
    %57 = vector.load %arg8[%c0_27, %c0_28] : memref<3x64xf32, #tpu.memory_space<vmem>>, vector<3x64xf32>
    %cst_29 = arith.constant dense<0.000000e+00> : vector<3x256xf32>
    %58 = tpu.matmul %57, %56, %cst_29 {dimension_numbers = #tpu.dot_dimension_numbers<[1], [0], [0], [1], [0, 0, 1, 1], [], []>} : vector<3x64xf32>, vector<64x256xf32>, vector<3x256xf32> -> vector<3x256xf32>
    %c0_30 = arith.constant 0 : index
    %c0_31 = arith.constant 0 : index
    %59 = vector.load %arg9[%c0_30, %c0_31] : memref<3x1xf32, #tpu.memory_space<vmem>>, vector<3x1xf32>
    %60 = vector.broadcast %59 : vector<3x1xf32> to vector<3x256xf32>
    %61 = arith.addf %58, %60 : vector<3x256xf32>
    %c0_32 = arith.constant 0 : index
    %c0_33 = arith.constant 0 : index
    %c0_34 = arith.constant 0 : index
    %62 = vector.load %arg10[%c0_32, %c0_33, %c0_34] : memref<1x3x256xf32, #tpu.memory_space<vmem>>, vector<1x3x256xf32>
    %63 = vector.shape_cast %62 : vector<1x3x256xf32> to vector<3x256xf32>
    %64 = vector.shape_cast %61 : vector<3x256xf32> to vector<1x3x256xf32>
    tpu.vector_store %arg10[%c0_32, %c0_33, %c0_34], %64 {strides = array<i32>} : memref<1x3x256xf32, #tpu.memory_space<vmem>>, vector<1x3x256xf32>,
    return
  }
  func.func @transform_0(%arg0: i32, %arg1: i32) -> (i32, i32, i32) {
    %c0_i32 = arith.constant 0 : i32
    %c0_i32_0 = arith.constant 0 : i32
    %c0_i32_1 = arith.constant 0 : i32
    return %arg1, %c0_i32, %c0_i32_0 : i32, i32, i32
  }
  func.func @transform_1(%arg0: i32, %arg1: i32) -> (i32, i32) {
    %c0_i32 = arith.constant 0 : i32
    %c0_i32_0 = arith.constant 0 : i32
    return %c0_i32, %arg0 : i32, i32
  }
  func.func @transform_2(%arg0: i32, %arg1: i32) -> (i32, i32, i32) {
    %c0_i32 = arith.constant 0 : i32
    %c0_i32_0 = arith.constant 0 : i32
    return %arg1, %c0_i32, %arg0 : i32, i32, i32
  }
  func.func @transform_3(%arg0: i32, %arg1: i32) -> (i32, i32) {
    %c0_i32 = arith.constant 0 : i32
    %c0_i32_0 = arith.constant 0 : i32
    %c0_i32_1 = arith.constant 0 : i32
    return %c0_i32, %c0_i32_0 : i32, i32
  }
  func.func @transform_4(%arg0: i32, %arg1: i32) -> (i32, i32) {
    %c0_i32 = arith.constant 0 : i32
    %c0_i32_0 = arith.constant 0 : i32
    %c0_i32_1 = arith.constant 0 : i32
    return %c0_i32, %c0_i32_0 : i32, i32
  }
  func.func @transform_5(%arg0: i32, %arg1: i32) -> (i32, i32) {
    %c0_i32 = arith.constant 0 : i32
    %c0_i32_0 = arith.constant 0 : i32
    %c0_i32_1 = arith.constant 0 : i32
    return %c0_i32, %c0_i32_0 : i32, i32
  }
  func.func @transform_6(%arg0: i32, %arg1: i32) -> (i32, i32) {
    %c0_i32 = arith.constant 0 : i32
    %c0_i32_0 = arith.constant 0 : i32
    %c0_i32_1 = arith.constant 0 : i32
    return %c0_i32, %c0_i32_0 : i32, i32
  }
  func.func @transform_7(%arg0: i32, %arg1: i32) -> (i32, i32) {
    %c0_i32 = arith.constant 0 : i32
    %c0_i32_0 = arith.constant 0 : i32
    %c0_i32_1 = arith.constant 0 : i32
    return %c0_i32, %c0_i32_0 : i32, i32
  }
  func.func @transform_8(%arg0: i32, %arg1: i32) -> (i32, i32, i32) {
    %c0_i32 = arith.constant 0 : i32
    %c0_i32_0 = arith.constant 0 : i32
    return %arg1, %c0_i32, %arg0 : i32, i32, i32
  }
}

</mosaic_0001>

<bundles_post_ra>
// kernel: tpu_custom_call.1
= control target key start
LH: loop header
LB: loop body
LE: loop exit
PB: predicated region body
PF: predicated region fallthrough
CT: control target
= control target key end

     0   :  { %s1399_s27 = smov 0   ;;  %s1401_s28 = smov 0   ;;  %s1597_s0 = inlined_call_operand.vmem [shape: f32[2,64,1], index: 0, kind: input, shape index: {}]   ;;  %s1598_s1 = inlined_call_operand.vmem [shape: f32[16,256], index: 1, kind: input, shape index: {}]   ;;  %s1599_s2 = inlined_call_operand.vmem [shape: f32[2,3,256], index: 2, kind: input, shape index: {}]   ;;  %s1600_s3 = inlined_call_operand.vmem [shape: f32[64,36], index: 3, kind: input, shape index: {}]   ;;  %s1601_s4 = inlined_call_operand.vmem [shape: f32[64,64], index: 4, kind: input, shape index: {}]   ;;  %s1602_s5 = inlined_call_operand.vmem [shape: f32[64,1], index: 5, kind: input, shape index: {}]   ;;  %s1603_s6 = inlined_call_operand.vmem [shape: f32[3,64], index: 6, kind: input, shape index: {}]   ;;  %s1604_s7 = inlined_call_operand.vmem [shape: f32[3,1], index: 7, kind: input, shape index: {}]   ;;  %s1605_s8 = inlined_call_operand.vmem [shape: f32[2,3,256], index: 8, kind: output, shape index: {}]  }
   0x1   :  { %s1403_s29 = smov 0  }
   0x2 LB: > { %s27_s30 = sadd.s32 1, %s1344_s28  ;;  %p1219_p0 = scmp.ge.s32.totalorder %s1348_s29, 1  ;;  %s1348_s29 = sphi %s1403_s29, %s18_s29   ;;  %s1344_s28 = sphi %s1401_s28, %s1609_s28   ;;  %s1340_s27 = sphi %s1399_s27, %s1608_s27  }
   0x3   : > { %p28_p1 = scmp.ge.s32.totalorder %s27_s30, 2  ;;  %p304_p2 = scmp.lt.s32.totalorder %s1348_s29, 3 }
   0x5   : > { %s1611_s30 = smov (%p28_p1, %s27_s30), 0  ;;  %p305_p3 = pnand %p1219_p0, %p304_p2 }
   0x6   : > { %p356_p4 = scmp.lt.s32.totalorder (!%p305_p3), %s1340_s27, 1  ;;  %p1226_p5 = scmp.ne.s32.totalorder (!%p305_p3), %s1340_s27, 0 }
   0x7   : > { %308 = sbr.rel (%p305_p3) target bundleno = 801 (0x321), region = 52 }
   0xe   : > { %s357_s9 = scalar_select %p356_p4, %s1340_s27, 1 }
   0xf   : > { %390 = sbr.rel (%p1226_p5) target bundleno = 22 (0x16), region = 56  ;;  %v391_v0 = vld [vmem:[%s1598_s1] sm:$0xff] (!%p1226_p5)  ;;  %v392_v1 = vld [vmem:[%s1598_s1 + $0x8] sm:$0xff] (!%p1226_p5)  ;;  %v393_v2 = vld [vmem:[%s1598_s1 + $0x10] sm:$0xff] (!%p1226_p5) }
  0x10   : > { %s1251_s10 = sshll.u32 %s357_s9, 6  ;;  %s1252_s11 = sshll.u32 %s357_s9, 3  ;;  %395 = vst [vmem:[#allocation2] sm:$0xff] (!%p1226_p5), %v391_v0  ;;  %396 = vst [vmem:[#allocation2 + $0x8] sm:$0xff] (!%p1226_p5), %v392_v1  ;;  %v394_v3 = vld [vmem:[%s1598_s1 + $0x18] sm:$0xff] (!%p1226_p5) }
  0x11   : > { %s1420_s14 = scalar_lea.vmem %s1597_s0, %s1251_s10  ;;  %s375_s17 = scalar_lea.vmem %s1599_s2, %s1252_s11  ;;  %397 = vst [vmem:[#allocation2 + $0x10] sm:$0xff] (!%p1226_p5), %v393_v2  ;;  %398 = vst [vmem:[#allocation2 + $0x18] sm:$0xff] (!%p1226_p5), %v394_v3 }
  0x12   : > { %s1428_s20 = scalar_lea.vmem %s1605_s8, %s1252_s11 }
  0x16 PF: > { %v413_v7 = vlaneseq  ;;  %v399_v10 = vld [vmem:[%s375_s17] sm:$0x77]  ;;  %v1350_v14 = vmov 1.0   ;;  %v1351_v17 = vmov 0.0   ;;  %v1352_v18 = vmov 0   ;;  %v597_v20 = vld [vmem:[%s1420_s14 + $0x10] sm:$0xff] }
  0x17   : > { %v586_v4 = vld [vmem:[#allocation2 + $0x8] sm:$0xff]  ;;  %v585_v6 = vld [vmem:[#allocation2] sm:$0xff]  ;;  %v1442_v12 = vmul.f32 %v399_v10, %v399_v10  ;;  %739 = vmatprep.mubr.f32.mxu0 %v1351_v17  ;;  %1322 = vset.pattern.permute.xlu0 %v1352_v18  ;;  %v598_v23 = vld [vmem:[%s1420_s14 + $0x18] sm:$0xff]  ;;  %vm490_vm1 = vcmask 1041408   ;;  %vm523_vm2 = vcmask 1040384   ;;  %vm668_vm3 = vcmask 1043456  }
  0x18   : > { %v588_v5 = vld [vmem:[#allocation2 + $0x18] sm:$0xff]  ;;  %v587_v9 = vld [vmem:[#allocation2 + $0x10] sm:$0xff]  ;;  %vm1444_vm0 = vcmp.lt.s32.totalorder %v413_v7, 256  ;;  %v595_v19 = vld [vmem:[%s1420_s14] sm:$0xff]  ;;  %1323 = vset.pattern.permute.xlu1 %v1352_v18  ;;  %949 = vmatprep.mubr.f32.mxu1 %v1351_v17  ;;  %v1461_v28 = vshrl.u32 %v413_v7, 7  ;;  %vm643_vm4 = vcmask 293888  }
  0x19   : > { %v1254_v8 = vpack.c.bf16 %v588_v5, %v586_v4  ;;  %v1256_v11 = vpack.c.bf16 %v587_v9, %v585_v6  ;;  %441 = vst.msk [vmem:[#allocation2 + $0x20] ss:$8 sm:$0x3] %vm1444_vm0, %v1350_v14  ;;  %v1227_v15 = vrot.slane %v1442_v12, 9  ;;  %v1228_v16 = vrot.slane %v1442_v12, 10  ;;  %605 = vperm.xlu0 %1322, %v595_v19   ;;  %615 = vperm.xlu1 %1323, %v597_v20   ;;  %v596_v22 = vld [vmem:[%s1420_s14 + $0x8] sm:$0xff] }
  0x1a   : > { %v599_v26 = vld [vmem:[%s1420_s14 + $0x20] sm:$0xff]  ;;  %v600_v27 = vld [vmem:[%s1420_s14 + $0x28] sm:$0xff]  ;;  %v601_v29 = vld [vmem:[%s1420_s14 + $0x30] sm:$0xff]  ;;  %v415_v31 = vsub.s32 0, %v1461_v28  ;;  %v419_v32 = vsub.s32 4, %v1461_v28  ;;  %v515_v50 = vsub.s32 2, %v1461_v28 }
  0x1b   : > { %1255 = vmatprep.subr.bf16.mxu0 %v1254_v8  ;;  %v405_v21 = vadd.f32 %v1227_v15, %v1442_v12  ;;  %v602_v30 = vld [vmem:[%s1420_s14 + $0x38] sm:$0xff]  ;;  %v812_v33 = vld [vmem:[%s1602_s5] sm:$0xff]  ;;  %v813_v34 = vld [vmem:[%s1602_s5 + $0x8] sm:$0xff]  ;;  %v519_v51 = vsub.s32 6, %v1461_v28  ;;  %v1353_v54 = vmov 1966171168  }
  0x1c   : > { %1257 = vmatpush1.bf16.msra.mxu0 %v1256_v11  ;;  %v814_v39 = vld [vmem:[%s1602_s5 + $0x10] sm:$0xff]  ;;  %v815_v40 = vld [vmem:[%s1602_s5 + $0x18] sm:$0xff]  ;;  %v816_v48 = vld [vmem:[%s1602_s5 + $0x20] sm:$0xff]  ;;  %v560_v55 = vunpack.c.l.s4 %v1353_v54  ;;  %vm860_vm5 = vcmask 523264  }
  0x1d   : > { %v409_v24 = vadd.f32 %v1228_v16, %v405_v21  ;;  %610 = vperm.xlu0 %1322, %v596_v22   ;;  %620 = vperm.xlu1 %1323, %v598_v23   ;;  %v817_v49 = vld [vmem:[%s1602_s5 + $0x28] sm:$0xff]  ;;  %v818_v60 = vld [vmem:[%s1602_s5 + $0x30] sm:$0xff]  ;;  %v819_v61 = vld [vmem:[%s1602_s5 + $0x38] sm:$0xff] }
  0x1e   : > { %v561_v8 = vunpack.c.0.s8 %v560_v55  ;;  %v1015_v14 = vld [vmem:[%s1604_s7] sm:$0x7]  ;;  %v578_v13 = vld [vmem:[%s1600_s3 + $0x8] sm:$0xff] }
  0x1f   : > { %v410_v25 = vmax.f32 %v409_v24, 1e-24 }
  0x20   : > { %v564_v23 = vsub.s32 %v561_v8, %v1461_v28 }
  0x21   : > { %1324 = vrsqrt.f32 %v410_v25  ;;  %625 = vperm.xlu0 %1322, %v599_v26   ;;  %630 = vperm.xlu1 %1323, %v600_v27  }
  0x25   : > { %635 = vperm.xlu0 %1322, %v601_v29   ;;  %640 = vperm.xlu1 %1323, %v602_v30  }
  0x29   : > { %822 = vperm.xlu0 %1322, %v812_v33   ;;  %827 = vperm.xlu1 %1323, %v813_v34  }
  0x2b   : > { %v1325_v35 = vpop.eup %1324 }
  0x2c   : > { %v416_v36 = vrot.slane %v1325_v35, %v415_v31  ;;  %v420_v37 = vrot.slane %v1325_v35, %v419_v32  ;;  %v451_v38 = vmul.f32 %v1325_v35, %v1325_v35 }
  0x2d   : > { %832 = vperm.xlu0 %1322, %v814_v39   ;;  %837 = vperm.xlu1 %1323, %v815_v40  }
  0x2e   : > { %v426_v41 = vrot.slane %v416_v36, %v415_v31  ;;  %v430_v42 = vrot.slane %v420_v37, %v415_v31  ;;  %v456_v43 = vrot.slane %v451_v38, %v415_v31  ;;  %v460_v44 = vrot.slane %v451_v38, %v419_v32 }
  0x30   : > { %v433_v45 = vcombine.low %v426_v41, %v430_v42  ;;  %v466_v46 = vrot.slane %v456_v43, %v415_v31  ;;  %v470_v47 = vrot.slane %v460_v44, %v415_v31  ;;  %v577_v42 = vld [vmem:[%s1600_s3] sm:$0xff]  ;;  %v579_v43 = vld [vmem:[%s1600_s3 + $0x10] sm:$0xff]  ;;  %v580_v44 = vld [vmem:[%s1600_s3 + $0x18] sm:$0xff] }
  0x31   : > { %842 = vperm.xlu0 %1322, %v816_v48   ;;  %847 = vperm.xlu1 %1323, %v817_v49   ;;  %v584_v48 = vld [vmem:[%s1600_s3 + $0x38] sm:$0xff] }
  0x32   : > { %v435_v52 = vmul.f32 %v433_v45, %v399_v10  ;;  %v473_v53 = vcombine.low %v466_v46, %v470_v47  ;;  %v581_v45 = vld [vmem:[%s1600_s3 + $0x20] sm:$0xff]  ;;  %v582_v46 = vld [vmem:[%s1600_s3 + $0x28] sm:$0xff]  ;;  %v583_v47 = vld [vmem:[%s1600_s3 + $0x30] sm:$0xff] }
  0x34   : > { %v444_v56 = vcombine.high %v435_v52, %v435_v52  ;;  %v475_v57 = vmul.f32 %v473_v53, %v1442_v12  ;;  %v476_v58 = vrot.slane %v435_v52, 1  ;;  %v483_v59 = vrot.slane %v435_v52, %v415_v31 }
  0x35   : > { %v487_v62 = vrot.slane %v435_v52, %v419_v32  ;;  %v445_v63 = vrot.slane %v435_v52, 7  ;;  %v516_v0 = vrot.slane %v435_v52, %v515_v50  ;;  %v520_v1 = vrot.slane %v435_v52, %v519_v51  ;;  %852 = vperm.xlu0 %1322, %v818_v60   ;;  %857 = vperm.xlu1 %1323, %v819_v61  }
  0x36   : > { %v446_v2 = vrot.slane %v444_v56, 7  ;;  %v477_v3 = vrot.slane %v444_v56, 1  ;;  %v491_v4 = vsel %vm490_vm1, %v476_v58, %v483_v59  ;;  %502 = vst [vmem:[#allocation2 + $0x28] sm:$0x70] %v475_v57  ;;  %v526_v5 = vmul.f32 %v475_v57, %v435_v52 }
  0x37   : > { %449 = vst [vmem:[#allocation2 + $0x20] sm:$0xe] %v445_v63  ;;  %v499_v6 = vcombine.low %v475_v57, %v475_v57  ;;  %v524_v7 = vsel %vm523_vm2, %v516_v0, %v445_v63  ;;  %v1229_v19 = vrot.slane %v435_v52, 10 }
  0x38   : > { %450 = vst [vmem:[#allocation2 + $0x28] sm:$0xe] %v446_v2  ;;  %v492_v9 = vsel %vm490_vm1, %v477_v3, %v487_v62  ;;  %v528_v10 = vcombine.high %v526_v5, %v526_v5  ;;  %v529_v11 = vrot.slane %v526_v5, 6  ;;  %v525_v12 = vsel %vm523_vm2, %v520_v1, %v446_v2 }
  0x39   : > { %v495_v15 = vcombine.low %v491_v4, %v492_v9  ;;  %501 = vst [vmem:[#allocation2 + $0x20] sm:$0x70] %v499_v6  ;;  %v546_v16 = vcombine.low %v524_v7, %v525_v12  ;;  %1018 = vperm.xlu0 %1322, %v1015_v14  }
  0x3a   : > { %v530_v18 = vrot.slane %v528_v10, 6  ;;  %533 = vst [vmem:[#allocation2 + $0x30] sm:$0x1c] %v529_v11 }
  0x3b   : > { %v497_v20 = vmul.f32 %v495_v15, %v435_v52  ;;  %v535_v21 = vmul.f32 %v495_v15, %v475_v57  ;;  %v548_v22 = vmul.f32 %v546_v16, %v475_v57 }
  0x3c   : > { %534 = vst [vmem:[#allocation2 + $0x38] sm:$0x1c] %v530_v18 }
  0x3d   : > { %v504_v24 = vcombine.high %v497_v20, %v497_v20  ;;  %v537_v25 = vcombine.high %v535_v21, %v535_v21  ;;  %v505_v26 = vrot.slane %v497_v20, 1  ;;  %v538_v27 = vrot.slane %v535_v21, 3  ;;  %552 = vst [vmem:[#allocation2 + $0x40] sm:$0x7] %v548_v22 }
  0x3e   : > { %v550_v29 = vcombine.high %v548_v22, %v548_v22  ;;  %v557_v30 = vmul.f32 %v1229_v19, %v497_v20 }
  0x3f   : > { %v506_v31 = vrot.slane %v504_v24, 1  ;;  %v539_v32 = vrot.slane %v537_v25, 3  ;;  %509 = vst [vmem:[#allocation2 + $0x30] ss:$-12 sps:$4 sm:$0x83] %v505_v26  }
  0x40   : > { %542 = vst [vmem:[#allocation2 + $0x30] sm:$0xe0] %v538_v27  ;;  %553 = vst [vmem:[#allocation2 + $0x48] sm:$0x7] %v550_v29  ;;  %v565_v33 = vrot.slane %v557_v30, %v564_v23 }
  0x41   : > { %510 = vst [vmem:[#allocation2 + $0x38] ss:$-12 sps:$4 sm:$0x83] %v506_v31   ;;  %543 = vst [vmem:[#allocation2 + $0x38] sm:$0xe0] %v539_v32 }
  0x42   : > { %v572_v34 = vrot.slane %v565_v33, %v564_v23 }
  0x44   : > { %575 = vst.msk [vmem:[#allocation2 + $0x43] ss:$8 sm:$0x3] %vm1444_vm0, %v572_v34 }
  0x46   : > { %v589_v28 = vld [vmem:[#allocation2 + $0x20] sm:$0xff] }
  0x47   : > { %v591_v35 = vld [vmem:[#allocation2 + $0x30] sm:$0xff] }
  0x48   : > { %v590_v36 = vld [vmem:[#allocation2 + $0x28] sm:$0xff]  ;;  %v592_v37 = vld [vmem:[#allocation2 + $0x38] sm:$0xff]  ;;  %v1260_v38 = vpack.c.bf16 %v591_v35, %v589_v28 }
  0x49   : > { %v1258_v39 = vpack.c.bf16 %v592_v37, %v590_v36 }
  0x4b   : > { %1259 = vmatprep.subr.bf16.mxu0 %v1258_v39  ;;  %v594_v40 = vld [vmem:[#allocation2 + $0x48] sm:$0xf]  ;;  %v593_v41 = vld [vmem:[#allocation2 + $0x40] sm:$0xf] }
  0x4c   : > { %1261 = vmatpush1.bf16.msra.mxu0 %v1260_v38 }
  0x4d   : > { %1230 = vmatprep.subr.msk.mxu0 %vm668_vm3, %v594_v40 }
  0x50   : > { %1231 = vmatpush1.msk.msra.mxu0 %vm668_vm3, %v593_v41 }
  0x51   : > { %1232 = vmatmul.mubr.msk.f32.vlgmr.msra.gmra.mrb[0].mxu0 %vm643_vm4, %v577_v42 }
  0x52   : > { %745 = vmatprep.mubr.f32.mxu0 %v1351_v17 }
  0x55   : > { %1233 = vmatmul.mubr.msk.f32.gmra.mrb[2].mxu0 %vm643_vm4, %v578_v13 }
  0x56   : > { %751 = vmatprep.mubr.f32.mxu0 %v1351_v17 }
  0x59   : > { %1234 = vmatmul.mubr.msk.f32.gmra.mrb[4].mxu0 %vm643_vm4, %v579_v43 }
  0x5a   : > { %757 = vmatprep.mubr.f32.mxu0 %v1351_v17 }
  0x5d   : > { %1235 = vmatmul.mubr.msk.f32.gmra.mrb[6].mxu0 %vm643_vm4, %v580_v44 }
  0x5e   : > { %763 = vmatprep.mubr.f32.mxu0 %v1351_v17 }
  0x61   : > { %1236 = vmatmul.mubr.msk.f32.gmra.mrb[8].mxu0 %vm643_vm4, %v581_v45 }
  0x62   : > { %769 = vmatprep.mubr.f32.mxu0 %v1351_v17 }
  0x65   : > { %1237 = vmatmul.mubr.msk.f32.gmra.mrb[10].mxu0 %vm643_vm4, %v582_v46 }
  0x66   : > { %775 = vmatprep.mubr.f32.mxu0 %v1351_v17 }
  0x69   : > { %1238 = vmatmul.mubr.msk.f32.gmra.mrb[12].mxu0 %vm643_vm4, %v583_v47 }
  0x6a   : > { %781 = vmatprep.mubr.f32.mxu0 %v1351_v17 }
  0x6d   : > { %1239 = vmatmul.mubr.msk.f32.gmra.mrb[14].mxu0 %vm643_vm4, %v584_v48 }
  0x6e   : > { %1088 = vmatprep.mubr.f32.mxu0 %v1351_v17 }
  0x98   : > { %v606_v49 = vpop.permute.xlu0 %605  ;;  %v616_v58 = vpop.permute.xlu1 %615 }
  0x9c   : > { %v611_v53 = vpop.permute.xlu0 %610  ;;  %v621_v5 = vpop.permute.xlu1 %620 }
  0xa0   : > { %v626_v20 = vpop.permute.xlu0 %625  ;;  %v631_v23 = vpop.permute.xlu1 %630 }
  0xa4   : > { %v636_v36 = vpop.permute.xlu0 %635  ;;  %v641_v39 = vpop.permute.xlu1 %640 }
 0x124   : > { %v741_v50 = vpop.f32.mrb[0].mxu0 }
 0x125   : > { %v743_v51 = vpop.f32.mrb[1].mxu0  ;;  %v742_v52 = vadd.f32 %v741_v50, %v606_v49  ;;  %v804_v50 = vld [vmem:[%s1601_s4] sm:$0xff] }
 0x126   : > { %v744_v54 = vadd.f32 %v743_v51, %v606_v49  ;;  %v805_v51 = vld [vmem:[%s1601_s4 + $0x8] sm:$0xff] }
 0x127   : > { %v788_v60 = vmax.f32 %v742_v52, 0.0  ;;  %v806_v52 = vld [vmem:[%s1601_s4 + $0x10] sm:$0xff] }
 0x128   : > { %v747_v55 = vpop.f32.mrb[2].mxu0  ;;  %v789_v62 = vmax.f32 %v744_v54, 0.0  ;;  %v808_v54 = vld [vmem:[%s1601_s4 + $0x20] sm:$0xff] }
 0x129   : > { %v748_v56 = vadd.f32 %v747_v55, %v611_v53  ;;  %v749_v57 = vpop.f32.mrb[3].mxu0  ;;  %v809_v55 = vld [vmem:[%s1601_s4 + $0x28] sm:$0xff] }
 0x12a   : > { %v750_v59 = vadd.f32 %v749_v57, %v611_v53  ;;  %v807_v53 = vld [vmem:[%s1601_s4 + $0x18] sm:$0xff] }
 0x12b   : > { %v790_v61 = vmax.f32 %v748_v56, 0.0  ;;  %v810_v56 = vld [vmem:[%s1601_s4 + $0x30] sm:$0xff]  ;;  %v811_v57 = vld [vmem:[%s1601_s4 + $0x38] sm:$0xff] }
 0x12c   : > { %v791_v63 = vmax.f32 %v750_v59, 0.0  ;;  %v753_v0 = vpop.f32.mrb[4].mxu0 }
 0x12d   : > { %v755_v1 = vpop.f32.mrb[5].mxu0  ;;  %v1264_v2 = vpack.c.bf16 %v790_v61, %v788_v60  ;;  %v754_v4 = vadd.f32 %v753_v0, %v616_v58  ;;  %v823_v60 = vpop.permute.xlu0 %822 }
 0x12e   : > { %v1262_v3 = vpack.c.bf16 %v791_v63, %v789_v62  ;;  %v756_v6 = vadd.f32 %v755_v1, %v616_v58  ;;  %v828_v62 = vpop.permute.xlu1 %827 }
 0x12f   : > { %v792_v11 = vmax.f32 %v754_v4, 0.0 }
 0x130   : > { %v759_v7 = vpop.f32.mrb[6].mxu0  ;;  %1263 = vmatprep.subr.bf16.mxu1 %v1262_v3  ;;  %v793_v14 = vmax.f32 %v756_v6, 0.0 }
 0x131   : > { %v760_v8 = vadd.f32 %v759_v7, %v621_v5  ;;  %v761_v9 = vpop.f32.mrb[7].mxu0  ;;  %1265 = vmatpush1.bf16.msra.mxu1 %v1264_v2 }
 0x132   : > { %v762_v10 = vadd.f32 %v761_v9, %v621_v5 }
 0x133   : > { %v794_v12 = vmax.f32 %v760_v8, 0.0 }
 0x134   : > { %v795_v15 = vmax.f32 %v762_v10, 0.0  ;;  %v765_v16 = vpop.f32.mrb[8].mxu0  ;;  %v833_v10 = vpop.permute.xlu0 %832 }
 0x135   : > { %v1268_v18 = vpack.c.bf16 %v794_v12, %v792_v11  ;;  %v767_v19 = vpop.f32.mrb[9].mxu0  ;;  %v766_v22 = vadd.f32 %v765_v16, %v626_v20 }
 0x136   : > { %v1266_v21 = vpack.c.bf16 %v795_v15, %v793_v14  ;;  %v768_v24 = vadd.f32 %v767_v19, %v626_v20  ;;  %v838_v14 = vpop.permute.xlu1 %837 }
 0x137   : > { %v796_v30 = vmax.f32 %v766_v22, 0.0 }
 0x138   : > { %v771_v25 = vpop.f32.mrb[10].mxu0  ;;  %1267 = vmatprep.subr.bf16.mxu1 %v1266_v21  ;;  %v797_v32 = vmax.f32 %v768_v24, 0.0 }
 0x139   : > { %v772_v26 = vadd.f32 %v771_v25, %v631_v23  ;;  %v773_v27 = vpop.f32.mrb[11].mxu0  ;;  %1269 = vmatpush1.bf16.msra.mxu1 %v1268_v18 }
 0x13a   : > { %v774_v29 = vadd.f32 %v773_v27, %v631_v23 }
 0x13b   : > { %v798_v31 = vmax.f32 %v772_v26, 0.0 }
 0x13c   : > { %v799_v33 = vmax.f32 %v774_v29, 0.0  ;;  %v777_v34 = vpop.f32.mrb[12].mxu0  ;;  %v843_v29 = vpop.permute.xlu0 %842 }
 0x13d   : > { %v1272_v28 = vpack.c.bf16 %v798_v31, %v796_v30  ;;  %v779_v35 = vpop.f32.mrb[13].mxu0  ;;  %v778_v38 = vadd.f32 %v777_v34, %v636_v36 }
 0x13e   : > { %v1270_v37 = vpack.c.bf16 %v799_v33, %v797_v32  ;;  %v780_v40 = vadd.f32 %v779_v35, %v636_v36  ;;  %v848_v32 = vpop.permute.xlu1 %847 }
 0x13f   : > { %v800_v44 = vmax.f32 %v778_v38, 0.0 }
 0x140   : > { %v783_v41 = vpop.f32.mrb[14].mxu0  ;;  %1271 = vmatprep.subr.bf16.mxu1 %v1270_v37  ;;  %v801_v46 = vmax.f32 %v780_v40, 0.0 }
 0x141   : > { %v784_v42 = vadd.f32 %v783_v41, %v641_v39  ;;  %v785_v13 = vpop.f32.mrb[15].mxu0  ;;  %1273 = vmatpush1.bf16.msra.mxu1 %v1272_v28 }
 0x142   : > { %v786_v43 = vadd.f32 %v785_v13, %v641_v39 }
 0x143   : > { %v802_v45 = vmax.f32 %v784_v42, 0.0 }
 0x144   : > { %v803_v47 = vmax.f32 %v786_v43, 0.0  ;;  %v853_v43 = vpop.permute.xlu0 %852 }
 0x145   : > { %v1276_v48 = vpack.c.bf16 %v802_v45, %v800_v44 }
 0x146   : > { %v1274_v49 = vpack.c.bf16 %v803_v47, %v801_v46  ;;  %v858_v46 = vpop.permute.xlu1 %857 }
 0x148   : > { %1275 = vmatprep.subr.bf16.mxu1 %v1274_v49 }
 0x149   : > { %1277 = vmatpush1.bf16.msra.mxu1 %v1276_v48 }
 0x14c   : > { %1240 = vmatmul.mubr.msk.f32.vlgmr.msra.gmra.mrb[0].mxu1 %vm860_vm5, %v804_v50 }
 0x14d   : > { %955 = vmatprep.mubr.f32.mxu1 %v1351_v17 }
 0x150   : > { %1241 = vmatmul.mubr.msk.f32.gmra.mrb[2].mxu1 %vm860_vm5, %v805_v51 }
 0x151   : > { %961 = vmatprep.mubr.f32.mxu1 %v1351_v17 }
 0x154   : > { %1242 = vmatmul.mubr.msk.f32.gmra.mrb[4].mxu1 %vm860_vm5, %v806_v52 }
 0x155   : > { %967 = vmatprep.mubr.f32.mxu1 %v1351_v17 }
 0x158   : > { %1243 = vmatmul.mubr.msk.f32.gmra.mrb[6].mxu1 %vm860_vm5, %v807_v53 }
 0x159   : > { %973 = vmatprep.mubr.f32.mxu1 %v1351_v17 }
 0x15c   : > { %1244 = vmatmul.mubr.msk.f32.gmra.mrb[8].mxu1 %vm860_vm5, %v808_v54 }
 0x15d   : > { %979 = vmatprep.mubr.f32.mxu1 %v1351_v17 }
 0x160   : > { %1245 = vmatmul.mubr.msk.f32.gmra.mrb[10].mxu1 %vm860_vm5, %v809_v55 }
 0x161   : > { %985 = vmatprep.mubr.f32.mxu1 %v1351_v17 }
 0x164   : > { %1246 = vmatmul.mubr.msk.f32.gmra.mrb[12].mxu1 %vm860_vm5, %v810_v56 }
 0x165   : > { %991 = vmatprep.mubr.f32.mxu1 %v1351_v17 }
 0x168   : > { %1247 = vmatmul.mubr.msk.f32.gmra.mrb[14].mxu1 %vm860_vm5, %v811_v57 }
 0x21f   : > { %v951_v58 = vpop.f32.mrb[0].mxu1 }
 0x220   : > { %v953_v59 = vpop.f32.mrb[1].mxu1  ;;  %v952_v61 = vadd.f32 %v951_v58, %v823_v60  ;;  %v1014_v58 = vld [vmem:[%s1603_s6] sm:$0x7] }
 0x221   : > { %v954_v63 = vadd.f32 %v953_v59, %v823_v60  ;;  %v1019_v59 = vpop.permute.xlu0 %1018 }
 0x222   : > { %v998_v4 = vmax.f32 %v952_v61, 0.0 }
 0x223   : > { %v957_v0 = vpop.f32.mrb[2].mxu1  ;;  %v999_v6 = vmax.f32 %v954_v63, 0.0 }
 0x224   : > { %v958_v1 = vadd.f32 %v957_v0, %v828_v62  ;;  %v959_v2 = vpop.f32.mrb[3].mxu1 }
 0x225   : > { %v960_v3 = vadd.f32 %v959_v2, %v828_v62 }
 0x226   : > { %v1000_v5 = vmax.f32 %v958_v1, 0.0 }
 0x227   : > { %v1001_v17 = vmax.f32 %v960_v3, 0.0  ;;  %v963_v7 = vpop.f32.mrb[4].mxu1 }
 0x228   : > { %v1280_v8 = vpack.c.bf16 %v1000_v5, %v998_v4  ;;  %v965_v9 = vpop.f32.mrb[5].mxu1  ;;  %v964_v12 = vadd.f32 %v963_v7, %v833_v10 }
 0x229   : > { %v1278_v11 = vpack.c.bf16 %v1001_v17, %v999_v6  ;;  %v966_v15 = vadd.f32 %v965_v9, %v833_v10 }
 0x22a   : > { %v1002_v21 = vmax.f32 %v964_v12, 0.0 }
 0x22b   : > { %v969_v16 = vpop.f32.mrb[6].mxu1  ;;  %1279 = vmatprep.subr.bf16.mxu0 %v1278_v11  ;;  %v1003_v23 = vmax.f32 %v966_v15, 0.0 }
 0x22c   : > { %v970_v18 = vadd.f32 %v969_v16, %v838_v14  ;;  %v971_v19 = vpop.f32.mrb[7].mxu1  ;;  %1281 = vmatpush1.bf16.msra.mxu0 %v1280_v8 }
 0x22d   : > { %v972_v20 = vadd.f32 %v971_v19, %v838_v14 }
 0x22e   : > { %v1004_v22 = vmax.f32 %v970_v18, 0.0 }
 0x22f   : > { %v1005_v24 = vmax.f32 %v972_v20, 0.0  ;;  %v975_v25 = vpop.f32.mrb[8].mxu1 }
 0x230   : > { %v1284_v26 = vpack.c.bf16 %v1004_v22, %v1002_v21  ;;  %v977_v27 = vpop.f32.mrb[9].mxu1  ;;  %v976_v31 = vadd.f32 %v975_v25, %v843_v29 }
 0x231   : > { %v1282_v30 = vpack.c.bf16 %v1005_v24, %v1003_v23  ;;  %v978_v33 = vadd.f32 %v977_v27, %v843_v29 }
 0x232   : > { %v1006_v37 = vmax.f32 %v976_v31, 0.0 }
 0x233   : > { %v981_v34 = vpop.f32.mrb[10].mxu1  ;;  %1283 = vmatprep.subr.bf16.mxu0 %v1282_v30  ;;  %v1007_v39 = vmax.f32 %v978_v33, 0.0 }
 0x234   : > { %v982_v28 = vadd.f32 %v981_v34, %v848_v32  ;;  %v983_v35 = vpop.f32.mrb[11].mxu1  ;;  %1285 = vmatpush1.bf16.msra.mxu0 %v1284_v26 }
 0x235   : > { %v984_v36 = vadd.f32 %v983_v35, %v848_v32 }
 0x236   : > { %v1008_v38 = vmax.f32 %v982_v28, 0.0 }
 0x237   : > { %v1009_v40 = vmax.f32 %v984_v36, 0.0  ;;  %v987_v41 = vpop.f32.mrb[12].mxu1 }
 0x238   : > { %v1288_v42 = vpack.c.bf16 %v1008_v38, %v1006_v37  ;;  %v989_v13 = vpop.f32.mrb[13].mxu1  ;;  %v988_v45 = vadd.f32 %v987_v41, %v853_v43 }
 0x239   : > { %v1286_v44 = vpack.c.bf16 %v1009_v40, %v1007_v39  ;;  %v990_v47 = vadd.f32 %v989_v13, %v853_v43 }
 0x23a   : > { %v1010_v52 = vmax.f32 %v988_v45, 0.0 }
 0x23b   : > { %v993_v48 = vpop.f32.mrb[14].mxu1  ;;  %1287 = vmatprep.subr.bf16.mxu0 %v1286_v44  ;;  %v1011_v54 = vmax.f32 %v990_v47, 0.0 }
 0x23c   : > { %v994_v49 = vadd.f32 %v993_v48, %v858_v46  ;;  %v995_v50 = vpop.f32.mrb[15].mxu1  ;;  %1289 = vmatpush1.bf16.msra.mxu0 %v1288_v42 }
 0x23d   : > { %v996_v51 = vadd.f32 %v995_v50, %v858_v46 }
 0x23e   : > { %v1012_v53 = vmax.f32 %v994_v49, 0.0 }
 0x23f   : > { %v1013_v55 = vmax.f32 %v996_v51, 0.0 }
 0x240   : > { %v1292_v56 = vpack.c.bf16 %v1012_v53, %v1010_v52 }
 0x241   : > { %v1290_v57 = vpack.c.bf16 %v1013_v55, %v1011_v54 }
 0x243   : > { %1291 = vmatprep.subr.bf16.mxu0 %v1290_v57 }
 0x244   : > { %1293 = vmatpush1.bf16.msra.mxu0 %v1292_v56 }
 0x247   : > { %1248 = vmatmul.mubr.msk.f32.vlgmr.msra.gmra.mrb[16].mxu0 %vm860_vm5, %v1014_v58 }
 0x31a   : > { %v1090_v60 = vpop.f32.mrb[16].mxu0 }
 0x31b   : > { %v1091_v61 = vadd.f32 %v1090_v60, %v1019_v59  ;;  %v1092_v62 = vpop.f32.mrb[17].mxu0 }
 0x31c   : > { %v1093_v63 = vadd.f32 %v1092_v62, %v1019_v59 }
 0x31e   : > { %v1097_v0 = vcombine.low %v1091_v61, %v1093_v63 }
 0x320   : > { %1099 = vst [vmem:[%s1428_s20] sm:$0x77] %v1097_v0 }
 0x321 PF: > { %s18_s29 = sadd.s32 1, %s1348_s29   ;;  %s1608_s27 = smov %s1344_s28 }
 0x322   : > { %p15_p6 = scmp.ge.s32.totalorder %s18_s29, 4   ;;  %s1609_s28 = smov %s1611_s30 }
 0x324   :  { %17 = sbr.rel (!%p15_p6) target bundleno = 2 (0x2), region = 94 }

</bundles_post_ra>
